<compile_context>
chip_gen: v6e
topology: v6e:2x2x1
jax: 0.10.0
libtpu: 0.0.40
codegen_flags: <defaults>
</compile_context>

<pallas_src>
import jax
import jax.numpy as jnp
from jax.experimental import pallas as pl
from jax.experimental.pallas import tpu as pltpu


# ----------------------------------------------------------------------------
# Model configuration (small synthetic shapes consistent with the module)
# ----------------------------------------------------------------------------
B = 1              # batch (module hard-codes B = 1)
N_CAM = 2          # num cameras (module uses 6; kept small)
C_IN = 4           # input image channels
H_IN, W_IN = 16, 16
C_BB = 16          # backbone output channels
C_EMB = 32         # embed dim (module uses 256)
H_FEAT, W_FEAT = 8, 8
DEPTH_NUM = 4      # module's depth_num (64 in the real head)
D3 = DEPTH_NUM * 3
NUM_QUERY = 16
NUM_CLASSES = 10
CODE_SIZE = 10
FFN_DIM = 64
MAX_NUM = 8
HEAD_PAD = 128     # cls+reg head padded to a lane-dense output slab
POSITION_RANGE = (-51.2, -51.2, -5.0, 51.2, 51.2, 3.0)

M_TOTAL = N_CAM * H_FEAT * W_FEAT   # 128 memory (key/value) rows
TQ = 8             # query tile  -> 2 "parallel" grid steps (v7x dual-TC)
TKV = 64           # KV tile     -> 2 "arbitrary" steps (online softmax)
PADW = 128         # every weight zero-padded to (PADW, PADW) in the slab

# weight-slab indices (one bf16 (NW, 128, 128) slab ref)
(W_NECK, W_PE1, W_PE2, W_WQ, W_WK, W_WV, W_WO, W_FFN1, W_FFN2, W_HEAD) = range(10)
NW = 10
# bias / layernorm slab indices (one f32 (NB, 128) slab ref)
(B_BB, B_NECK, B_PE1, B_PE2, B_BQ, B_BK, B_BV, B_BO,
 B_LN1G, B_LN1B, B_FFN1, B_FFN2, B_LN2G, B_LN2B, B_HEAD) = range(15)
NB = 16            # rows padded to a sublane multiple


# ----------------------------------------------------------------------------
# Fused Pallas kernel: stem-bias/ReLU + neck + pos-encoder + decoder + heads
# grid = (query tiles [parallel], KV tiles [arbitrary])
# ----------------------------------------------------------------------------
def _petr_core_kernel(stem_ref, c3d_ref, qpos_ref, w_ref, b_ref, out_ref,
                      m_sc, l_sc, acc_sc):
    f32 = jnp.float32
    bf16 = jnp.bfloat16
    kv = pl.program_id(1)
    nkv = pl.num_programs(1)

    def w(i, kdim, ndim):
        return w_ref[i, :kdim, :ndim]          # bf16 sub-block of the slab

    def b(i, ndim):
        return b_ref[i:i + 1, :ndim]            # (1, ndim) f32 row

    def mm(a, wi, kdim, ndim):
        a = a if a.dtype == bf16 else a.astype(bf16)
        return jnp.dot(a, w(wi, kdim, ndim), preferred_element_type=f32)

    def ln(x, gi, bi, eps=1e-5):
        mu = jnp.mean(x, axis=-1, keepdims=True)
        xc = x - mu
        var = jnp.mean(xc * xc, axis=-1, keepdims=True)
        return xc * jax.lax.rsqrt(var + eps) * b(gi, C_EMB) + b(bi, C_EMB)

    @pl.when(kv == 0)
    def _():
        m_sc[...] = jnp.full_like(m_sc, -1e30)
        l_sc[...] = jnp.zeros_like(l_sc)
        acc_sc[...] = jnp.zeros_like(acc_sc)

    # ---- memory-side producer for this KV tile --------------------------
    # img_backbone stem bias+ReLU  ->  img_neck 1x1 proj
    h0 = jnp.maximum(stem_ref[...].astype(f32) + b(B_BB, C_BB), 0.0)
    memory = mm(h0, W_NECK, C_BB, C_EMB) + b(B_NECK, C_EMB)
    # pts_bbox_head.position_encoder MLP on coords3d
    p0 = jnp.maximum(mm(c3d_ref[...], W_PE1, D3, 4 * C_EMB)
                     + b(B_PE1, 4 * C_EMB), 0.0)
    pos_embed = mm(p0, W_PE2, 4 * C_EMB, C_EMB) + b(B_PE2, C_EMB)
    # key = memory + pos_embed (folded into the k-projection input)
    key_in = memory + pos_embed
    k = mm(key_in, W_WK, C_EMB, C_EMB) + b(B_BK, C_EMB)
    v = mm(memory, W_WV, C_EMB, C_EMB) + b(B_BV, C_EMB)

    # ---- query projection for this query tile (1/sqrt(C) folded into wq) -
    q = mm(qpos_ref[...], W_WQ, C_EMB, C_EMB) + b(B_BQ, C_EMB)

    # ---- flash-style online-softmax cross-attention ----------------------
    s = jax.lax.dot_general(q.astype(bf16), k.astype(bf16),
                            dimension_numbers=(((1,), (1,)), ((), ())),
                            preferred_element_type=f32)          # (TQ, TKV)
    # mask padded key rows (none at these toy shapes; required at real 6000)
    kv_row = kv * TKV + jax.lax.broadcasted_iota(jnp.int32, s.shape, 1)
    s = jnp.where(kv_row < M_TOTAL, s, -1e30)

    m_new = jnp.maximum(m_sc[...], jnp.max(s, axis=-1, keepdims=True))
    alpha = jnp.exp(m_sc[...] - m_new)
    p = jnp.exp(s - m_new)
    l_sc[...] = alpha * l_sc[...] + jnp.sum(p, axis=-1, keepdims=True)
    acc_sc[...] = alpha * acc_sc[...] + jnp.dot(
        p.astype(bf16), v.astype(bf16), preferred_element_type=f32)
    m_sc[...] = m_new

    # ---- epilogue: out-proj, LN1, FFN, residual+LN2, fused cls+reg head --
    @pl.when(kv == nkv - 1)
    def _():
        attn = acc_sc[...] * pl.reciprocal(l_sc[...], approx=True)
        attn = mm(attn, W_WO, C_EMB, C_EMB) + b(B_BO, C_EMB)
        tgt = ln(attn, B_LN1G, B_LN1B)
        h = jnp.maximum(mm(tgt, W_FFN1, C_EMB, FFN_DIM)
                        + b(B_FFN1, FFN_DIM), 0.0)
        h = mm(h, W_FFN2, FFN_DIM, C_EMB) + b(B_FFN2, C_EMB)
        tgt = ln(tgt + h, B_LN2G, B_LN2B)
        # single lane-dense (TQ, HEAD_PAD) store
        out_ref[...] = mm(tgt, W_HEAD, C_EMB, HEAD_PAD) + b(B_HEAD, HEAD_PAD)


def petr_core(stem, c3d, query_pos, w_all, b_all):
    q_tiles = NUM_QUERY // TQ
    kv_tiles = M_TOTAL // TKV
    grid = (q_tiles, kv_tiles)

    # advisory cost estimate for the XLA scheduler
    flops_kv = 2 * TKV * (C_BB * C_EMB + D3 * 4 * C_EMB
                          + 4 * C_EMB * C_EMB + 2 * C_EMB * C_EMB)
    flops_attn = 2 * TQ * (C_EMB * C_EMB + 2 * TKV * C_EMB)
    flops_tail = 2 * TQ * (C_EMB * C_EMB + 2 * C_EMB * FFN_DIM
                           + C_EMB * HEAD_PAD)
    total_flops = grid[0] * grid[1] * (flops_kv + flops_attn) + grid[0] * flops_tail
    bytes_accessed = (stem.size * stem.dtype.itemsize
                      + c3d.size * c3d.dtype.itemsize
                      + query_pos.size * query_pos.dtype.itemsize
                      + w_all.size * w_all.dtype.itemsize
                      + b_all.size * b_all.dtype.itemsize
                      + NUM_QUERY * HEAD_PAD * 4)

    return pl.pallas_call(
        _petr_core_kernel,
        grid=grid,
        in_specs=[
            pl.BlockSpec((TKV, C_BB), lambda qi, kvi: (kvi, 0)),     # stem tile
            pl.BlockSpec((TKV, D3), lambda qi, kvi: (kvi, 0)),       # coords3d tile
            pl.BlockSpec((TQ, C_EMB), lambda qi, kvi: (qi, 0)),      # query tile
            pl.BlockSpec((NW, PADW, PADW), lambda qi, kvi: (0, 0, 0)),  # weight slab
            pl.BlockSpec((NB, PADW), lambda qi, kvi: (0, 0)),           # bias/LN slab
        ],
        out_specs=pl.BlockSpec((TQ, HEAD_PAD), lambda qi, kvi: (qi, 0)),
        out_shape=jax.ShapeDtypeStruct((NUM_QUERY, HEAD_PAD), jnp.float32),
        scratch_shapes=[
            pltpu.VMEM((TQ, 1), jnp.float32),       # running max  m
            pltpu.VMEM((TQ, 1), jnp.float32),       # running sum  l
            pltpu.VMEM((TQ, C_EMB), jnp.float32),   # attention acc
        ],
        compiler_params=pltpu.CompilerParams(
            dimension_semantics=("parallel", "arbitrary"),
            vmem_limit_bytes=32 * 1024 * 1024,
        ),
        cost_estimate=pl.CostEstimate(
            flops=int(total_flops),
            transcendentals=int(grid[0] * grid[1] * TQ * (TKV + 2)),
            bytes_accessed=int(bytes_accessed),
        ),
    )(stem, c3d, query_pos, w_all, b_all)


# ----------------------------------------------------------------------------
# Parameters
# ----------------------------------------------------------------------------
def init_params(key):
    def nrm(k, shape, scale=0.02):
        return scale * jax.random.normal(k, shape, dtype=jnp.float32)

    ks = jax.random.split(key, 16)
    p = {}
    p["conv_w"] = nrm(ks[0], (3, 3, C_IN, C_BB))             # HWIO stem conv
    p["bb_b"] = jnp.zeros((C_BB,), jnp.float32)
    p["neck_w"] = nrm(ks[1], (C_BB, C_EMB));     p["neck_b"] = jnp.zeros((C_EMB,), jnp.float32)
    p["pe_w1"] = nrm(ks[2], (D3, 4 * C_EMB));    p["pe_b1"] = jnp.zeros((4 * C_EMB,), jnp.float32)
    p["pe_w2"] = nrm(ks[3], (4 * C_EMB, C_EMB)); p["pe_b2"] = jnp.zeros((C_EMB,), jnp.float32)
    p["query_pos"] = nrm(ks[4], (NUM_QUERY, C_EMB), 1.0)
    p["wq"] = nrm(ks[5], (C_EMB, C_EMB));        p["bq"] = jnp.zeros((C_EMB,), jnp.float32)
    p["wk"] = nrm(ks[6], (C_EMB, C_EMB));        p["bk"] = jnp.zeros((C_EMB,), jnp.float32)
    p["wv"] = nrm(ks[7], (C_EMB, C_EMB));        p["bv"] = jnp.zeros((C_EMB,), jnp.float32)
    p["wo"] = nrm(ks[8], (C_EMB, C_EMB));        p["bo"] = jnp.zeros((C_EMB,), jnp.float32)
    p["ln1_g"] = jnp.ones((C_EMB,), jnp.float32); p["ln1_b"] = jnp.zeros((C_EMB,), jnp.float32)
    p["ffn_w1"] = nrm(ks[9], (C_EMB, FFN_DIM));   p["ffn_b1"] = jnp.zeros((FFN_DIM,), jnp.float32)
    p["ffn_w2"] = nrm(ks[10], (FFN_DIM, C_EMB));  p["ffn_b2"] = jnp.zeros((C_EMB,), jnp.float32)
    p["ln2_g"] = jnp.ones((C_EMB,), jnp.float32); p["ln2_b"] = jnp.zeros((C_EMB,), jnp.float32)
    p["cls_w"] = nrm(ks[11], (C_EMB, NUM_CLASSES)); p["cls_b"] = jnp.zeros((NUM_CLASSES,), jnp.float32)
    p["reg_w"] = nrm(ks[12], (C_EMB, CODE_SIZE));   p["reg_b"] = jnp.zeros((CODE_SIZE,), jnp.float32)
    return p


def pack_params(p):
    """One-time packing: all weights -> ONE bf16 (NW,128,128) slab, all
    biases/LN params -> ONE f32 (NB,128) slab, attention scale folded into
    the q projection, cls+reg head concatenated into a lane-dense slab,
    query_pos pre-cast to bf16."""
    bf16 = jnp.bfloat16
    scale = 1.0 / float(C_EMB) ** 0.5

    head_w = jnp.concatenate([p["cls_w"], p["reg_w"]], axis=1)   # (C_EMB, 20)
    head_b = jnp.concatenate([p["cls_b"], p["reg_b"]], axis=0)   # (20,)

    def padw(w):
        kk, nn = w.shape
        return jnp.pad(w, ((0, PADW - kk), (0, PADW - nn)))

    w_all = jnp.stack([
        padw(p["neck_w"]), padw(p["pe_w1"]), padw(p["pe_w2"]),
        padw(p["wq"] * scale), padw(p["wk"]), padw(p["wv"]), padw(p["wo"]),
        padw(p["ffn_w1"]), padw(p["ffn_w2"]), padw(head_w),
    ]).astype(bf16)                                              # (NW,128,128)

    def padb(v):
        return jnp.pad(v, ((0, PADW - v.shape[0]),))

    rows = [p["bb_b"], p["neck_b"], p["pe_b1"], p["pe_b2"],
            p["bq"] * scale, p["bk"], p["bv"], p["bo"],
            p["ln1_g"], p["ln1_b"], p["ffn_b1"], p["ffn_b2"],
            p["ln2_g"], p["ln2_b"], head_b]
    rows += [jnp.zeros((PADW,), jnp.float32)] * (NB - len(rows))
    b_all = jnp.stack([padb(r) for r in rows]).astype(jnp.float32)  # (NB,128)

    return {
        "conv_w": p["conv_w"].astype(bf16),
        "w_all": w_all,
        "b_all": b_all,
        "query_pos": p["query_pos"].astype(bf16),
    }


def layout_coords3d(coords3d):
    """coords3d is constant per camera rig: lay it out channels-last,
    flattened to memory rows, bf16, ONCE at setup (not per forward)."""
    return jnp.transpose(coords3d, (0, 2, 3, 1)).reshape(-1, D3).astype(jnp.bfloat16)


# ----------------------------------------------------------------------------
# Forward pass (mirrors PETR_export_model.forward(img, coords3d))
# ----------------------------------------------------------------------------
@jax.jit
def petr_forward(img_nchw, c3d_rows, pp):
    # img_nchw : (N_CAM, C_IN, H_IN, W_IN)   -- PyTorch NCHW
    # c3d_rows : (M_TOTAL, D3) bf16          -- pre-laid-out coords3d
    # stem 3x3/s2 conv via lax.conv (no 9x im2col HBM expansion); bf16 in,
    # f32 accumulate, bf16 out to halve HBM->VMEM bytes into the kernel.
    x = jnp.transpose(img_nchw, (0, 2, 3, 1)).astype(jnp.bfloat16)      # NHWC
    stem = jax.lax.conv_general_dilated(
        x, pp["conv_w"], window_strides=(2, 2), padding=((1, 1), (1, 1)),
        dimension_numbers=("NHWC", "HWIO", "NHWC"),
        preferred_element_type=jnp.float32)
    stem = stem.reshape(M_TOTAL, C_BB).astype(jnp.bfloat16)

    # fused VMEM-resident kernel: stem-bias/relu -> neck -> pos-enc -> decoder -> heads
    head = petr_core(stem, c3d_rows, pp["query_pos"], pp["w_all"], pp["b_all"])
    cls_logits = head[:, :NUM_CLASSES]
    bbox_preds = head[:, NUM_CLASSES:NUM_CLASSES + CODE_SIZE]

    # --- get_bboxes_onnx / NMSFreeCoder decode (plain-JAX glue) -------------
    pr = POSITION_RANGE
    flat = jax.nn.sigmoid(cls_logits).reshape(-1)
    scores, indices = jax.lax.top_k(flat, MAX_NUM)
    labels = indices % NUM_CLASSES
    bbox_index = indices // NUM_CLASSES
    bp = bbox_preds[bbox_index]                               # (MAX_NUM, CODE_SIZE)
    # sigmoid stands in for PETRHead.forward's sigmoid on (cx,cy,cz)
    # (reference-point addition omitted); range-scale mirrors get_bboxes_onnx.
    cx = jax.nn.sigmoid(bp[:, 0]) * (pr[3] - pr[0]) + pr[0]
    cy = jax.nn.sigmoid(bp[:, 1]) * (pr[4] - pr[1]) + pr[1]
    cz = jax.nn.sigmoid(bp[:, 4]) * (pr[5] - pr[2]) + pr[2]
    w = jnp.exp(bp[:, 2]); l = jnp.exp(bp[:, 3]); hgt = jnp.exp(bp[:, 5])
    rot = jnp.arctan2(bp[:, 6], bp[:, 7])
    vx, vy = bp[:, 8], bp[:, 9]
    bboxes = jnp.stack([cx, cy, cz, w, l, hgt, rot, vx, vy], axis=-1)

    # bbox_list: one (bboxes, scores, labels) tuple per batch sample (B = 1)
    return [(bboxes, scores, labels)]


# ----------------------------------------------------------------------------
if __name__ == "__main__":
    root = jax.random.PRNGKey(0)
    k_img, k_c3d, k_par = jax.random.split(root, 3)

    img = jax.random.normal(k_img, (N_CAM, C_IN, H_IN, W_IN), dtype=jnp.float32)
    coords3d = jax.random.normal(
        k_c3d, (B * N_CAM, D3, H_FEAT, W_FEAT), dtype=jnp.float32)

    params = pack_params(init_params(k_par))   # one-time weight packing
    c3d_rows = layout_coords3d(coords3d)       # one-time coords3d layout

    bbox_list = petr_forward(img, c3d_rows, params)
    bboxes, scores, labels = bbox_list[0]
    jax.block_until_ready((bboxes, scores, labels))

    assert bboxes.shape == (MAX_NUM, 9)
    assert scores.shape == (MAX_NUM,)
    assert labels.shape == (MAX_NUM,)
    assert bool(jnp.all(jnp.isfinite(bboxes)))
    print("KERNEL_OK")
</pallas_src>

<mosaic_0001>
module attributes {stable_mosaic.version = 11 : i64} {
  func.func @_petr_core_kernel(%arg0: i32, %arg1: i32, %arg2: memref<64x16xbf16, #tpu.memory_space<vmem>>, %arg3: memref<64x12xbf16, #tpu.memory_space<vmem>>, %arg4: memref<8x32xbf16, #tpu.memory_space<vmem>>, %arg5: memref<10x128x128xbf16, #tpu.memory_space<vmem>>, %arg6: memref<16x128xf32, #tpu.memory_space<vmem>>, %arg7: memref<8x128xf32, #tpu.memory_space<vmem>>, %arg8: memref<8x1xf32, #tpu.memory_space<vmem>>, %arg9: memref<8x1xf32, #tpu.memory_space<vmem>>, %arg10: memref<8x32xf32, #tpu.memory_space<vmem>>) attributes {dimension_semantics = [#tpu.dimension_semantics<parallel>, #tpu.dimension_semantics<arbitrary>], iteration_bounds = array<i64: 2, 2>, scalar_prefetch = 0 : i64, scratch_operands = 3 : i64, tpu.core_type = #tpu.core_type<tc>, window_params = [{transform_indices = @transform_0, window_bounds = array<i64: 64, 16>}, {transform_indices = @transform_1, window_bounds = array<i64: 64, 12>}, {transform_indices = @transform_2, window_bounds = array<i64: 8, 32>}, {pipeline_mode = #tpu.pipeline_mode<synchronous>, transform_indices = @transform_3, window_bounds = array<i64: 10, 128, 128>}, {pipeline_mode = #tpu.pipeline_mode<synchronous>, transform_indices = @transform_4, window_bounds = array<i64: 16, 128>}, {transform_indices = @transform_5, window_bounds = array<i64: 8, 128>}]} {
    %c0_i32 = arith.constant 0 : i32
    %0 = arith.cmpi eq, %arg1, %c0_i32 : i32
    %1 = arith.extui %0 : i1 to i32
    %c0_i32_0 = arith.constant 0 : i32
    %2 = arith.cmpi ne, %1, %c0_i32_0 : i32
    scf.if %2 {
      %cst_59 = arith.constant -1.000000e+30 : f32
      %94 = vector.broadcast %cst_59 : f32 to vector<8x1xf32>
      %c0_60 = arith.constant 0 : index
      %c0_61 = arith.constant 0 : index
      %95 = vector.load %arg8[%c0_60, %c0_61] : memref<8x1xf32, #tpu.memory_space<vmem>>, vector<8x1xf32>
      tpu.vector_store %arg8[%c0_60, %c0_61], %94 {strides = array<i32>} : memref<8x1xf32, #tpu.memory_space<vmem>>, vector<8x1xf32>,
      %cst_62 = arith.constant 0.000000e+00 : f32
      %96 = vector.broadcast %cst_62 : f32 to vector<8x1xf32>
      %c0_63 = arith.constant 0 : index
      %c0_64 = arith.constant 0 : index
      %97 = vector.load %arg9[%c0_63, %c0_64] : memref<8x1xf32, #tpu.memory_space<vmem>>, vector<8x1xf32>
      tpu.vector_store %arg9[%c0_63, %c0_64], %96 {strides = array<i32>} : memref<8x1xf32, #tpu.memory_space<vmem>>, vector<8x1xf32>,
      %cst_65 = arith.constant 0.000000e+00 : f32
      %98 = vector.broadcast %cst_65 : f32 to vector<8x32xf32>
      %c0_66 = arith.constant 0 : index
      %c0_67 = arith.constant 0 : index
      %99 = vector.load %arg10[%c0_66, %c0_67] : memref<8x32xf32, #tpu.memory_space<vmem>>, vector<8x32xf32>
      tpu.vector_store %arg10[%c0_66, %c0_67], %98 {strides = array<i32>} : memref<8x32xf32, #tpu.memory_space<vmem>>, vector<8x32xf32>,
    } else {
    }
    %c0 = arith.constant 0 : index
    %c0_1 = arith.constant 0 : index
    %3 = vector.load %arg2[%c0, %c0_1] : memref<64x16xbf16, #tpu.memory_space<vmem>>, vector<64x16xbf16>
    %4 = arith.extf %3 : vector<64x16xbf16> to vector<64x16xf32>
    %c0_2 = arith.constant 0 : index
    %c0_3 = arith.constant 0 : index
    %5 = vector.load %arg6[%c0_2, %c0_3] : memref<16x128xf32, #tpu.memory_space<vmem>>, vector<1x16xf32>
    %6 = vector.broadcast %5 : vector<1x16xf32> to vector<64x16xf32>
    %7 = arith.addf %4, %6 : vector<64x16xf32>
    %cst = arith.constant 0.000000e+00 : f32
    %8 = vector.broadcast %cst : f32 to vector<64x16xf32>
    %9 = arith.maximumf %7, %8 : vector<64x16xf32>
    %10 = arith.truncf %9 : vector<64x16xf32> to vector<64x16xbf16>
    %c0_4 = arith.constant 0 : index
    %c0_5 = arith.constant 0 : index
    %c0_6 = arith.constant 0 : index
    %11 = vector.load %arg5[%c0_4, %c0_5, %c0_6] : memref<10x128x128xbf16, #tpu.memory_space<vmem>>, vector<1x16x32xbf16>
    %12 = vector.shape_cast %11 : vector<1x16x32xbf16> to vector<16x32xbf16>
    %cst_7 = arith.constant dense<0.000000e+00> : vector<64x32xf32>
    %13 = tpu.matmul %10, %12, %cst_7 {dimension_numbers = #tpu.dot_dimension_numbers<[1], [0], [0], [1], [0, 0, 1, 1], [], []>} : vector<64x16xbf16>, vector<16x32xbf16>, vector<64x32xf32> -> vector<64x32xf32>
    %c1 = arith.constant 1 : index
    %c0_8 = arith.constant 0 : index
    %14 = vector.load %arg6[%c1, %c0_8] : memref<16x128xf32, #tpu.memory_space<vmem>>, vector<1x32xf32>
    %15 = vector.broadcast %14 : vector<1x32xf32> to vector<64x32xf32>
    %16 = arith.addf %13, %15 : vector<64x32xf32>
    %c0_9 = arith.constant 0 : index
    %c0_10 = arith.constant 0 : index
    %17 = vector.load %arg3[%c0_9, %c0_10] : memref<64x12xbf16, #tpu.memory_space<vmem>>, vector<64x12xbf16>
    %c1_11 = arith.constant 1 : index
    %c0_12 = arith.constant 0 : index
    %c0_13 = arith.constant 0 : index
    %18 = vector.load %arg5[%c1_11, %c0_12, %c0_13] : memref<10x128x128xbf16, #tpu.memory_space<vmem>>, vector<1x12x128xbf16>
    %19 = vector.shape_cast %18 : vector<1x12x128xbf16> to vector<12x128xbf16>
    %cst_14 = arith.constant dense<0.000000e+00> : vector<64x128xf32>
    %20 = tpu.matmul %17, %19, %cst_14 {dimension_numbers = #tpu.dot_dimension_numbers<[1], [0], [0], [1], [0, 0, 1, 1], [], []>} : vector<64x12xbf16>, vector<12x128xbf16>, vector<64x128xf32> -> vector<64x128xf32>
    %c2 = arith.constant 2 : index
    %c0_15 = arith.constant 0 : index
    %21 = vector.load %arg6[%c2, %c0_15] : memref<16x128xf32, #tpu.memory_space<vmem>>, vector<1x128xf32>
    %22 = vector.broadcast %21 : vector<1x128xf32> to vector<64x128xf32>
    %23 = arith.addf %20, %22 : vector<64x128xf32>
    %cst_16 = arith.constant 0.000000e+00 : f32
    %24 = vector.broadcast %cst_16 : f32 to vector<64x128xf32>
    %25 = arith.maximumf %23, %24 : vector<64x128xf32>
    %26 = arith.truncf %25 : vector<64x128xf32> to vector<64x128xbf16>
    %c2_17 = arith.constant 2 : index
    %c0_18 = arith.constant 0 : index
    %c0_19 = arith.constant 0 : index
    %27 = vector.load %arg5[%c2_17, %c0_18, %c0_19] : memref<10x128x128xbf16, #tpu.memory_space<vmem>>, vector<1x128x32xbf16>
    %28 = vector.shape_cast %27 : vector<1x128x32xbf16> to vector<128x32xbf16>
    %cst_20 = arith.constant dense<0.000000e+00> : vector<64x32xf32>
    %29 = tpu.matmul %26, %28, %cst_20 {dimension_numbers = #tpu.dot_dimension_numbers<[1], [0], [0], [1], [0, 0, 1, 1], [], []>} : vector<64x128xbf16>, vector<128x32xbf16>, vector<64x32xf32> -> vector<64x32xf32>
    %c3 = arith.constant 3 : index
    %c0_21 = arith.constant 0 : index
    %30 = vector.load %arg6[%c3, %c0_21] : memref<16x128xf32, #tpu.memory_space<vmem>>, vector<1x32xf32>
    %31 = vector.broadcast %30 : vector<1x32xf32> to vector<64x32xf32>
    %32 = arith.addf %29, %31 : vector<64x32xf32>
    %33 = arith.addf %16, %32 : vector<64x32xf32>
    %34 = arith.truncf %33 : vector<64x32xf32> to vector<64x32xbf16>
    %c4 = arith.constant 4 : index
    %c0_22 = arith.constant 0 : index
    %c0_23 = arith.constant 0 : index
    %35 = vector.load %arg5[%c4, %c0_22, %c0_23] : memref<10x128x128xbf16, #tpu.memory_space<vmem>>, vector<1x32x32xbf16>
    %36 = vector.shape_cast %35 : vector<1x32x32xbf16> to vector<32x32xbf16>
    %cst_24 = arith.constant dense<0.000000e+00> : vector<64x32xf32>
    %37 = tpu.matmul %34, %36, %cst_24 {dimension_numbers = #tpu.dot_dimension_numbers<[1], [0], [0], [1], [0, 0, 1, 1], [], []>} : vector<64x32xbf16>, vector<32x32xbf16>, vector<64x32xf32> -> vector<64x32xf32>
    %c5 = arith.constant 5 : index
    %c0_25 = arith.constant 0 : index
    %38 = vector.load %arg6[%c5, %c0_25] : memref<16x128xf32, #tpu.memory_space<vmem>>, vector<1x32xf32>
    %39 = vector.broadcast %38 : vector<1x32xf32> to vector<64x32xf32>
    %40 = arith.addf %37, %39 : vector<64x32xf32>
    %41 = arith.truncf %16 : vector<64x32xf32> to vector<64x32xbf16>
    %c5_26 = arith.constant 5 : index
    %c0_27 = arith.constant 0 : index
    %c0_28 = arith.constant 0 : index
    %42 = vector.load %arg5[%c5_26, %c0_27, %c0_28] : memref<10x128x128xbf16, #tpu.memory_space<vmem>>, vector<1x32x32xbf16>
    %43 = vector.shape_cast %42 : vector<1x32x32xbf16> to vector<32x32xbf16>
    %cst_29 = arith.constant dense<0.000000e+00> : vector<64x32xf32>
    %44 = tpu.matmul %41, %43, %cst_29 {dimension_numbers = #tpu.dot_dimension_numbers<[1], [0], [0], [1], [0, 0, 1, 1], [], []>} : vector<64x32xbf16>, vector<32x32xbf16>, vector<64x32xf32> -> vector<64x32xf32>
    %c6 = arith.constant 6 : index
    %c0_30 = arith.constant 0 : index
    %45 = vector.load %arg6[%c6, %c0_30] : memref<16x128xf32, #tpu.memory_space<vmem>>, vector<1x32xf32>
    %46 = vector.broadcast %45 : vector<1x32xf32> to vector<64x32xf32>
    %47 = arith.addf %44, %46 : vector<64x32xf32>
    %c0_31 = arith.constant 0 : index
    %c0_32 = arith.constant 0 : index
    %48 = vector.load %arg4[%c0_31, %c0_32] : memref<8x32xbf16, #tpu.memory_space<vmem>>, vector<8x32xbf16>
    %c3_33 = arith.constant 3 : index
    %c0_34 = arith.constant 0 : index
    %c0_35 = arith.constant 0 : index
    %49 = vector.load %arg5[%c3_33, %c0_34, %c0_35] : memref<10x128x128xbf16, #tpu.memory_space<vmem>>, vector<1x32x32xbf16>
    %50 = vector.shape_cast %49 : vector<1x32x32xbf16> to vector<32x32xbf16>
    %cst_36 = arith.constant dense<0.000000e+00> : vector<8x32xf32>
    %51 = tpu.matmul %48, %50, %cst_36 {dimension_numbers = #tpu.dot_dimension_numbers<[1], [0], [0], [1], [0, 0, 1, 1], [], []>} : vector<8x32xbf16>, vector<32x32xbf16>, vector<8x32xf32> -> vector<8x32xf32>
    %c4_37 = arith.constant 4 : index
    %c0_38 = arith.constant 0 : index
    %52 = vector.load %arg6[%c4_37, %c0_38] : memref<16x128xf32, #tpu.memory_space<vmem>>, vector<1x32xf32>
    %53 = vector.broadcast %52 : vector<1x32xf32> to vector<8x32xf32>
    %54 = arith.addf %51, %53 : vector<8x32xf32>
    %55 = arith.truncf %54 : vector<8x32xf32> to vector<8x32xbf16>
    %56 = arith.truncf %40 : vector<64x32xf32> to vector<64x32xbf16>
    %cst_39 = arith.constant dense<0.000000e+00> : vector<8x64xf32>
    %57 = tpu.matmul %55, %56, %cst_39 {dimension_numbers = #tpu.dot_dimension_numbers<[1], [1], [0], [0], [0, 0, 1, 0], [], []>} : vector<8x32xbf16>, vector<64x32xbf16>, vector<8x64xf32> -> vector<8x64xf32>
    %c64_i32 = arith.constant 64 : i32
    %58 = arith.muli %arg1, %c64_i32 : i32
    %59 = tpu.iota {dimensions = array<i32: 1>} : vector<8x64xi32>
    %60 = vector.broadcast %58 : i32 to vector<8x64xi32>
    %61 = arith.addi %60, %59 : vector<8x64xi32>
    %c128_i32 = arith.constant 128 : i32
    %62 = vector.broadcast %c128_i32 : i32 to vector<8x64xi32>
    %63 = arith.cmpi slt, %61, %62 : vector<8x64xi32>
    %cst_40 = arith.constant -1.000000e+30 : f32
    %64 = vector.broadcast %cst_40 : f32 to vector<8x64xf32>
    %65 = arith.select %63, %57, %64 : vector<8x64xi1>, vector<8x64xf32>
    %c0_41 = arith.constant 0 : index
    %c0_42 = arith.constant 0 : index
    %66 = vector.load %arg8[%c0_41, %c0_42] : memref<8x1xf32, #tpu.memory_space<vmem>>, vector<8x1xf32>
    %cst_43 = arith.constant dense<0xFF800000> : vector<8xf32>
    %67 = vector.multi_reduction <maximumf>, %65, %cst_43 [1] : vector<8x64xf32> to vector<8xf32>
    %68 = vector.shape_cast %67 : vector<8xf32> to vector<8x1xf32>
    %69 = arith.maximumf %66, %68 : vector<8x1xf32>
    %c0_44 = arith.constant 0 : index
    %c0_45 = arith.constant 0 : index
    %70 = vector.load %arg8[%c0_44, %c0_45] : memref<8x1xf32, #tpu.memory_space<vmem>>, vector<8x1xf32>
    %71 = arith.subf %70, %69 : vector<8x1xf32>
    %72 = math.exp %71 : vector<8x1xf32>
    %73 = vector.broadcast %69 : vector<8x1xf32> to vector<8x64xf32>
    %74 = arith.subf %65, %73 : vector<8x64xf32>
    %75 = math.exp %74 : vector<8x64xf32>
    %c0_46 = arith.constant 0 : index
    %c0_47 = arith.constant 0 : index
    %76 = vector.load %arg9[%c0_46, %c0_47] : memref<8x1xf32, #tpu.memory_space<vmem>>, vector<8x1xf32>
    %77 = arith.mulf %72, %76 : vector<8x1xf32>
    %cst_48 = arith.constant dense<0.000000e+00> : vector<8xf32>
    %78 = vector.multi_reduction <add>, %75, %cst_48 [1] : vector<8x64xf32> to vector<8xf32>
    %79 = vector.shape_cast %78 : vector<8xf32> to vector<8x1xf32>
    %80 = arith.addf %77, %79 : vector<8x1xf32>
    %c0_49 = arith.constant 0 : index
    %c0_50 = arith.constant 0 : index
    %81 = vector.load %arg9[%c0_49, %c0_50] : memref<8x1xf32, #tpu.memory_space<vmem>>, vector<8x1xf32>
    tpu.vector_store %arg9[%c0_49, %c0_50], %80 {strides = array<i32>} : memref<8x1xf32, #tpu.memory_space<vmem>>, vector<8x1xf32>,
    %c0_51 = arith.constant 0 : index
    %c0_52 = arith.constant 0 : index
    %82 = vector.load %arg10[%c0_51, %c0_52] : memref<8x32xf32, #tpu.memory_space<vmem>>, vector<8x32xf32>
    %83 = vector.broadcast %72 : vector<8x1xf32> to vector<8x32xf32>
    %84 = arith.mulf %83, %82 : vector<8x32xf32>
    %85 = arith.truncf %75 : vector<8x64xf32> to vector<8x64xbf16>
    %86 = arith.truncf %47 : vector<64x32xf32> to vector<64x32xbf16>
    %cst_53 = arith.constant dense<0.000000e+00> : vector<8x32xf32>
    %87 = tpu.matmul %85, %86, %cst_53 {dimension_numbers = #tpu.dot_dimension_numbers<[1], [0], [0], [1], [0, 0, 1, 1], [], []>} : vector<8x64xbf16>, vector<64x32xbf16>, vector<8x32xf32> -> vector<8x32xf32>
    %88 = arith.addf %84, %87 : vector<8x32xf32>
    %c0_54 = arith.constant 0 : index
    %c0_55 = arith.constant 0 : index
    %89 = vector.load %arg10[%c0_54, %c0_55] : memref<8x32xf32, #tpu.memory_space<vmem>>, vector<8x32xf32>
    tpu.vector_store %arg10[%c0_54, %c0_55], %88 {strides = array<i32>} : memref<8x32xf32, #tpu.memory_space<vmem>>, vector<8x32xf32>,
    %c0_56 = arith.constant 0 : index
    %c0_57 = arith.constant 0 : index
    %90 = vector.load %arg8[%c0_56, %c0_57] : memref<8x1xf32, #tpu.memory_space<vmem>>, vector<8x1xf32>
    tpu.vector_store %arg8[%c0_56, %c0_57], %69 {strides = array<i32>} : memref<8x1xf32, #tpu.memory_space<vmem>>, vector<8x1xf32>,
    %c1_i32 = arith.constant 1 : i32
    %91 = arith.cmpi eq, %arg1, %c1_i32 : i32
    %92 = arith.extui %91 : i1 to i32
    %c0_i32_58 = arith.constant 0 : i32
    %93 = arith.cmpi ne, %92, %c0_i32_58 : i32
    scf.if %93 {
      %c0_59 = arith.constant 0 : index
      %c0_60 = arith.constant 0 : index
      %94 = vector.load %arg10[%c0_59, %c0_60] : memref<8x32xf32, #tpu.memory_space<vmem>>, vector<8x32xf32>
      %c0_61 = arith.constant 0 : index
      %c0_62 = arith.constant 0 : index
      %95 = vector.load %arg9[%c0_61, %c0_62] : memref<8x1xf32, #tpu.memory_space<vmem>>, vector<8x1xf32>
      %96 = tpu.reciprocal %95 {approx = true} : vector<8x1xf32> -> vector<8x1xf32>
      %97 = vector.broadcast %96 : vector<8x1xf32> to vector<8x32xf32>
      %98 = arith.mulf %94, %97 : vector<8x32xf32>
      %99 = arith.truncf %98 : vector<8x32xf32> to vector<8x32xbf16>
      %c6_63 = arith.constant 6 : index
      %c0_64 = arith.constant 0 : index
      %c0_65 = arith.constant 0 : index
      %100 = vector.load %arg5[%c6_63, %c0_64, %c0_65] : memref<10x128x128xbf16, #tpu.memory_space<vmem>>, vector<1x32x32xbf16>
      %101 = vector.shape_cast %100 : vector<1x32x32xbf16> to vector<32x32xbf16>
      %cst_66 = arith.constant dense<0.000000e+00> : vector<8x32xf32>
      %102 = tpu.matmul %99, %101, %cst_66 {dimension_numbers = #tpu.dot_dimension_numbers<[1], [0], [0], [1], [0, 0, 1, 1], [], []>} : vector<8x32xbf16>, vector<32x32xbf16>, vector<8x32xf32> -> vector<8x32xf32>
      %c7 = arith.constant 7 : index
      %c0_67 = arith.constant 0 : index
      %103 = vector.load %arg6[%c7, %c0_67] : memref<16x128xf32, #tpu.memory_space<vmem>>, vector<1x32xf32>
      %104 = vector.broadcast %103 : vector<1x32xf32> to vector<8x32xf32>
      %105 = arith.addf %102, %104 : vector<8x32xf32>
      %cst_68 = arith.constant dense<0.000000e+00> : vector<8xf32>
      %106 = vector.multi_reduction <add>, %105, %cst_68 [1] : vector<8x32xf32> to vector<8xf32>
      %107 = vector.shape_cast %106 : vector<8xf32> to vector<8x1xf32>
      %cst_69 = arith.constant 3.200000e+01 : f32
      %108 = vector.broadcast %cst_69 : f32 to vector<8x1xf32>
      %109 = arith.divf %107, %108 : vector<8x1xf32>
      %110 = vector.broadcast %109 : vector<8x1xf32> to vector<8x32xf32>
      %111 = arith.subf %105, %110 : vector<8x32xf32>
      %112 = arith.mulf %111, %111 : vector<8x32xf32>
      %cst_70 = arith.constant dense<0.000000e+00> : vector<8xf32>
      %113 = vector.multi_reduction <add>, %112, %cst_70 [1] : vector<8x32xf32> to vector<8xf32>
      %114 = vector.shape_cast %113 : vector<8xf32> to vector<8x1xf32>
      %cst_71 = arith.constant 3.200000e+01 : f32
      %115 = vector.broadcast %cst_71 : f32 to vector<8x1xf32>
      %116 = arith.divf %114, %115 : vector<8x1xf32>
      %cst_72 = arith.constant 9.99999974E-6 : f32
      %117 = vector.broadcast %cst_72 : f32 to vector<8x1xf32>
      %118 = arith.addf %116, %117 : vector<8x1xf32>
      %119 = math.rsqrt %118 : vector<8x1xf32>
      %120 = vector.broadcast %119 : vector<8x1xf32> to vector<8x32xf32>
      %121 = arith.mulf %111, %120 : vector<8x32xf32>
      %c8 = arith.constant 8 : index
      %c0_73 = arith.constant 0 : index
      %122 = vector.load %arg6[%c8, %c0_73] : memref<16x128xf32, #tpu.memory_space<vmem>>, vector<1x32xf32>
      %123 = vector.broadcast %122 : vector<1x32xf32> to vector<8x32xf32>
      %124 = arith.mulf %121, %123 : vector<8x32xf32>
      %c9 = arith.constant 9 : index
      %c0_74 = arith.constant 0 : index
      %125 = vector.load %arg6[%c9, %c0_74] : memref<16x128xf32, #tpu.memory_space<vmem>>, vector<1x32xf32>
      %126 = vector.broadcast %125 : vector<1x32xf32> to vector<8x32xf32>
      %127 = arith.addf %124, %126 : vector<8x32xf32>
      %128 = arith.truncf %127 : vector<8x32xf32> to vector<8x32xbf16>
      %c7_75 = arith.constant 7 : index
      %c0_76 = arith.constant 0 : index
      %c0_77 = arith.constant 0 : index
      %129 = vector.load %arg5[%c7_75, %c0_76, %c0_77] : memref<10x128x128xbf16, #tpu.memory_space<vmem>>, vector<1x32x64xbf16>
      %130 = vector.shape_cast %129 : vector<1x32x64xbf16> to vector<32x64xbf16>
      %cst_78 = arith.constant dense<0.000000e+00> : vector<8x64xf32>
      %131 = tpu.matmul %128, %130, %cst_78 {dimension_numbers = #tpu.dot_dimension_numbers<[1], [0], [0], [1], [0, 0, 1, 1], [], []>} : vector<8x32xbf16>, vector<32x64xbf16>, vector<8x64xf32> -> vector<8x64xf32>
      %c10 = arith.constant 10 : index
      %c0_79 = arith.constant 0 : index
      %132 = vector.load %arg6[%c10, %c0_79] : memref<16x128xf32, #tpu.memory_space<vmem>>, vector<1x64xf32>
      %133 = vector.broadcast %132 : vector<1x64xf32> to vector<8x64xf32>
      %134 = arith.addf %131, %133 : vector<8x64xf32>
      %cst_80 = arith.constant 0.000000e+00 : f32
      %135 = vector.broadcast %cst_80 : f32 to vector<8x64xf32>
      %136 = arith.maximumf %134, %135 : vector<8x64xf32>
      %137 = arith.truncf %136 : vector<8x64xf32> to vector<8x64xbf16>
      %c8_81 = arith.constant 8 : index
      %c0_82 = arith.constant 0 : index
      %c0_83 = arith.constant 0 : index
      %138 = vector.load %arg5[%c8_81, %c0_82, %c0_83] : memref<10x128x128xbf16, #tpu.memory_space<vmem>>, vector<1x64x32xbf16>
      %139 = vector.shape_cast %138 : vector<1x64x32xbf16> to vector<64x32xbf16>
      %cst_84 = arith.constant dense<0.000000e+00> : vector<8x32xf32>
      %140 = tpu.matmul %137, %139, %cst_84 {dimension_numbers = #tpu.dot_dimension_numbers<[1], [0], [0], [1], [0, 0, 1, 1], [], []>} : vector<8x64xbf16>, vector<64x32xbf16>, vector<8x32xf32> -> vector<8x32xf32>
      %c11 = arith.constant 11 : index
      %c0_85 = arith.constant 0 : index
      %141 = vector.load %arg6[%c11, %c0_85] : memref<16x128xf32, #tpu.memory_space<vmem>>, vector<1x32xf32>
      %142 = vector.broadcast %141 : vector<1x32xf32> to vector<8x32xf32>
      %143 = arith.addf %140, %142 : vector<8x32xf32>
      %144 = arith.addf %127, %143 : vector<8x32xf32>
      %cst_86 = arith.constant dense<0.000000e+00> : vector<8xf32>
      %145 = vector.multi_reduction <add>, %144, %cst_86 [1] : vector<8x32xf32> to vector<8xf32>
      %146 = vector.shape_cast %145 : vector<8xf32> to vector<8x1xf32>
      %cst_87 = arith.constant 3.200000e+01 : f32
      %147 = vector.broadcast %cst_87 : f32 to vector<8x1xf32>
      %148 = arith.divf %146, %147 : vector<8x1xf32>
      %149 = vector.broadcast %148 : vector<8x1xf32> to vector<8x32xf32>
      %150 = arith.subf %144, %149 : vector<8x32xf32>
      %151 = arith.mulf %150, %150 : vector<8x32xf32>
      %cst_88 = arith.constant dense<0.000000e+00> : vector<8xf32>
      %152 = vector.multi_reduction <add>, %151, %cst_88 [1] : vector<8x32xf32> to vector<8xf32>
      %153 = vector.shape_cast %152 : vector<8xf32> to vector<8x1xf32>
      %cst_89 = arith.constant 3.200000e+01 : f32
      %154 = vector.broadcast %cst_89 : f32 to vector<8x1xf32>
      %155 = arith.divf %153, %154 : vector<8x1xf32>
      %cst_90 = arith.constant 9.99999974E-6 : f32
      %156 = vector.broadcast %cst_90 : f32 to vector<8x1xf32>
      %157 = arith.addf %155, %156 : vector<8x1xf32>
      %158 = math.rsqrt %157 : vector<8x1xf32>
      %159 = vector.broadcast %158 : vector<8x1xf32> to vector<8x32xf32>
      %160 = arith.mulf %150, %159 : vector<8x32xf32>
      %c12 = arith.constant 12 : index
      %c0_91 = arith.constant 0 : index
      %161 = vector.load %arg6[%c12, %c0_91] : memref<16x128xf32, #tpu.memory_space<vmem>>, vector<1x32xf32>
      %162 = vector.broadcast %161 : vector<1x32xf32> to vector<8x32xf32>
      %163 = arith.mulf %160, %162 : vector<8x32xf32>
      %c13 = arith.constant 13 : index
      %c0_92 = arith.constant 0 : index
      %164 = vector.load %arg6[%c13, %c0_92] : memref<16x128xf32, #tpu.memory_space<vmem>>, vector<1x32xf32>
      %165 = vector.broadcast %164 : vector<1x32xf32> to vector<8x32xf32>
      %166 = arith.addf %163, %165 : vector<8x32xf32>
      %167 = arith.truncf %166 : vector<8x32xf32> to vector<8x32xbf16>
      %c9_93 = arith.constant 9 : index
      %c0_94 = arith.constant 0 : index
      %c0_95 = arith.constant 0 : index
      %168 = vector.load %arg5[%c9_93, %c0_94, %c0_95] : memref<10x128x128xbf16, #tpu.memory_space<vmem>>, vector<1x32x128xbf16>
      %169 = vector.shape_cast %168 : vector<1x32x128xbf16> to vector<32x128xbf16>
      %cst_96 = arith.constant dense<0.000000e+00> : vector<8x128xf32>
      %170 = tpu.matmul %167, %169, %cst_96 {dimension_numbers = #tpu.dot_dimension_numbers<[1], [0], [0], [1], [0, 0, 1, 1], [], []>} : vector<8x32xbf16>, vector<32x128xbf16>, vector<8x128xf32> -> vector<8x128xf32>
      %c14 = arith.constant 14 : index
      %c0_97 = arith.constant 0 : index
      %171 = vector.load %arg6[%c14, %c0_97] : memref<16x128xf32, #tpu.memory_space<vmem>>, vector<1x128xf32>
      %172 = vector.broadcast %171 : vector<1x128xf32> to vector<8x128xf32>
      %173 = arith.addf %170, %172 : vector<8x128xf32>
      %c0_98 = arith.constant 0 : index
      %c0_99 = arith.constant 0 : index
      %174 = vector.load %arg7[%c0_98, %c0_99] : memref<8x128xf32, #tpu.memory_space<vmem>>, vector<8x128xf32>
      tpu.vector_store %arg7[%c0_98, %c0_99], %173 {strides = array<i32>} : memref<8x128xf32, #tpu.memory_space<vmem>>, vector<8x128xf32>,
    } else {
    }
    return
  }
  func.func @transform_0(%arg0: i32, %arg1: i32) -> (i32, i32) {
    %c0_i32 = arith.constant 0 : i32
    %c0_i32_0 = arith.constant 0 : i32
    return %arg1, %c0_i32 : i32, i32
  }
  func.func @transform_1(%arg0: i32, %arg1: i32) -> (i32, i32) {
    %c0_i32 = arith.constant 0 : i32
    %c0_i32_0 = arith.constant 0 : i32
    return %arg1, %c0_i32 : i32, i32
  }
  func.func @transform_2(%arg0: i32, %arg1: i32) -> (i32, i32) {
    %c0_i32 = arith.constant 0 : i32
    %c0_i32_0 = arith.constant 0 : i32
    return %arg0, %c0_i32 : i32, i32
  }
  func.func @transform_3(%arg0: i32, %arg1: i32) -> (i32, i32, i32) {
    %c0_i32 = arith.constant 0 : i32
    %c0_i32_0 = arith.constant 0 : i32
    %c0_i32_1 = arith.constant 0 : i32
    %c0_i32_2 = arith.constant 0 : i32
    return %c0_i32, %c0_i32_0, %c0_i32_1 : i32, i32, i32
  }
  func.func @transform_4(%arg0: i32, %arg1: i32) -> (i32, i32) {
    %c0_i32 = arith.constant 0 : i32
    %c0_i32_0 = arith.constant 0 : i32
    %c0_i32_1 = arith.constant 0 : i32
    return %c0_i32, %c0_i32_0 : i32, i32
  }
  func.func @transform_5(%arg0: i32, %arg1: i32) -> (i32, i32) {
    %c0_i32 = arith.constant 0 : i32
    %c0_i32_0 = arith.constant 0 : i32
    return %arg0, %c0_i32 : i32, i32
  }
}

</mosaic_0001>

<bundles_post_ra>
// kernel: petr_forward.1
= control target key start
LH: loop header
LB: loop body
LE: loop exit
PB: predicated region body
PF: predicated region fallthrough
CT: control target
= control target key end

     0   :  { %s2074_s18 = smov 0   ;;  %s2076_s19 = smov 0   ;;  %s2348_s0 = inlined_call_operand.vmem [shape: bf16[128,16], index: 0, kind: input, shape index: {}]   ;;  %s2349_s1 = inlined_call_operand.vmem [shape: bf16[128,12], index: 1, kind: input, shape index: {}]   ;;  %s2350_s2 = inlined_call_operand.vmem [shape: bf16[16,32], index: 2, kind: input, shape index: {}]   ;;  %s2351_s3 = inlined_call_operand.vmem [shape: bf16[10,128,128], index: 3, kind: input, shape index: {}]   ;;  %s2352_s4 = inlined_call_operand.vmem [shape: f32[16,128], index: 4, kind: input, shape index: {}]   ;;  %s2353_s5 = inlined_call_operand.vmem [shape: f32[16,128], index: 5, kind: output, shape index: {}]  }
   0x1   :  { %s2078_s20 = smov 0   ;;  %s2080_s21 = smov 0  }
   0x2   :  { %s2082_s22 = smov 0  }
   0x3 LB: > { %s24_s23 = sadd.s32 1, %s2026_s20  ;;  %s27_s24 = sadd.s32 1, %s2030_s21  ;;  %s2034_s22 = sphi %s2082_s22, %s15_s22   ;;  %s2030_s21 = sphi %s2080_s21, %s2357_s21   ;;  %s2026_s20 = sphi %s2078_s20, %s2356_s20   ;;  %s2022_s19 = sphi %s2076_s19, %s2355_s19   ;;  %s2018_s18 = sphi %s2074_s18, %s2354_s18  }
   0x4   : > { %p25_p0 = scmp.ge.s32.totalorder %s24_s23, 2  ;;  %p1558_p1 = scmp.ge.s32.totalorder %s2034_s22, 1 }
   0x5   : > { %p220_p2 = scmp.lt.s32.totalorder %s2034_s22, 5 }
   0x6   : > { %s2359_s23 = smov (%p25_p0, %s24_s23), 0  ;;  %s2361_s24 = smov (!%p25_p0, %s27_s24), %s2030_s21 }
   0x7   : > { %p221_p3 = pnand %p1558_p1, %p220_p2  ;;  %p29_p4 = scmp.ge.s32.totalorder %s2361_s24, 2 }
   0x8   : > { %s1559_s25 = sshll.u32 (!%p221_p3), %s2018_s18, 3  ;;  %p268_p5 = scmp.lt.s32.totalorder (!%p221_p3), %s2022_s19, 1 }
   0x9   : > { %s2363_s24 = smov (%p29_p4, %s2361_s24), 0  ;;  %224 = sbr.rel (%p221_p3) target bundleno = 2915 (0xb63), region = 40 }
   0xa   : > { %p257_p6 = scmp.lt.s32.totalorder (!%p221_p3), %s1559_s25, 15  ;;  %p1565_p7 = scmp.ne.s32.totalorder (!%p221_p3), %s2018_s18, 0 }
   0xe   : > { %s2365_s19 = smov (!%p268_p5, %s2022_s19), 1  ;;  %s2367_s25 = smov (!%p257_p6, %s1559_s25), 15 }
   0xf   : > { %s1563_s26 = sshll.u32 %s2365_s19, 2  ;;  %s1564_s27 = sshll.u32 %s2365_s19, 3 }
  0x10   : > { %s1560_s28 = sshll.u32 %s2367_s25, 2  ;;  %s2110_s6 = scalar_lea.vmem %s2350_s2, %s1563_s26 }
  0x11   : > { %s2115_s9 = scalar_lea.vmem %s2348_s0, %s1560_s28  ;;  %s2120_s12 = scalar_lea.vmem %s2349_s1, %s1560_s28 }
  0x12   : > { %s2125_s15 = scalar_lea.vmem %s2353_s5, %s1564_s27  ;;  %280 = sbr.rel (%p1565_p7) target bundleno = 26 (0x1a), region = 44 }
  0x17   : > { %vm281_vm0 = vcmask 7168   ;;  %vm284_vm1 = vcmask 261120   ;;  %v2036_v0 = vmov -1e+30   ;;  %v2037_v1 = vmov 0.0  }
  0x18   : > { %282 = vst.msk [vmem:[#allocation2] sm:$0xff] %vm281_vm0, %v2036_v0  ;;  %283 = vst.msk [vmem:[#allocation3] sm:$0xff] %vm281_vm0, %v2037_v1 }
  0x19   : > { %285 = vst.msk [vmem:[#allocation4] sm:$0xff] %vm284_vm1, %v2037_v1 }
  0x1a PF: > { %v1955_v2 = vld [vmem:[%s2351_s3 + $0x40] sm:$0x3f]   ;;  %vm472_vm2 = vcmask 1045504   ;;  %vm459_vm3 = vcmask 97280   ;;  %v1957_v5 = vld [vmem:[%s2120_s12 + $0x8] sm:$0xff]   ;;  %v1958_v6 = vld [vmem:[%s2120_s12 + $0x10] sm:$0xff]  }
  0x1b   : > { %v1956_v3 = vld [vmem:[%s2120_s12] sm:$0xff]   ;;  %1904 = vmatprep.subr.msk.bf16.mxu1 %vm472_vm2, %v1955_v2  ;;  %v474_v4 = vsel %vm472_vm2, %v1955_v2, 0  ;;  %v1704_v12 = vld [vmem:[%s2115_s9 + $0x8] sm:$0xff]   ;;  %v1961_v15 = vld [vmem:[%s2351_s3 + $0xb8] sm:$0xff]   ;;  %vm340_vm4 = vcmask 130048   ;;  %vm2039_vm5 = vmmov 0  }
  0x1c   : > { %1779 = vmatpush3.bf16.msra.mxu1 %v474_v4  ;;  %1780 = vmatprep.mubr.msk.bf16.mxu1 %vm459_vm3, %v1956_v3  ;;  %v1960_v7 = vld [vmem:[%s2351_s3] sm:$0xff]   ;;  %v1694_v13 = vunpack.c.l.bf16 %v1704_v12  ;;  %v1695_v14 = vunpack.c.h.bf16 %v1704_v12  ;;  %v1959_v18 = vld [vmem:[%s2120_s12 + $0x18] sm:$0xff]   ;;  %v1962_v25 = vld [vmem:[%s2351_s3 + $0xb0] sm:$0xff]   ;;  %vm722_vm6 = vcmask 261120   ;;  %vm1037_vm8 = vcmask 523264   ;;  %p1643_p8 = scmp.ne.s32.totalorder %s2018_s18, 1 }
  0x1d   : > { %v1689_v8 = vld [vmem:[%s2115_s9] sm:$0xff]   ;;  %1768 = vmatprep.subr.bf16.mxu0 %v1960_v7  ;;  %v1705_v26 = vld [vmem:[%s2115_s9 + $0x10] sm:$0xff]   ;;  %v1706_v27 = vld [vmem:[%s2115_s9 + $0x18] sm:$0xff]   ;;  %s1641_s9 = sshll.u32 %s2018_s18, 6  ;;  %vm1059_vm9 = vcmask 7168  }
  0x1e   : > { %v1566_v9 = vld [vmem:[%s2352_s4] ss:$0 sm:$0xff]  ;;  %v1690_v10 = vunpack.c.l.bf16 %v1689_v8  ;;  %v1691_v11 = vunpack.c.h.bf16 %v1689_v8  ;;  %1769 = vmatpush3.bf16.msra.mxu0 %v1960_v7  ;;  %v1698_v29 = vunpack.c.l.bf16 %v1705_v26  ;;  %v1699_v30 = vunpack.c.h.bf16 %v1705_v26  ;;  %v1963_v41 = vld [vmem:[%s2351_s3 + $0xa8] sm:$0xff]   ;;  %v1965_v46 = vld [vmem:[%s2351_s3 + $0x98] sm:$0xff]  }
  0x1f   : > { %1781 = vmatmul.mubr.msk.bf16.vlgmr.msra.gmra.mxu1 %vm459_vm3, %v1957_v5  ;;  %v309_v19 = vadd.f32 %v1694_v13, %v1566_v9  ;;  %v310_v20 = vadd.f32 %v1695_v14, %v1566_v9  ;;  %1788 = vmatprep.subr.bf16.mxu0 %v1961_v15  ;;  %v1702_v31 = vunpack.c.l.bf16 %v1706_v27  ;;  %v1703_v33 = vunpack.c.h.bf16 %v1706_v27  ;;  %v1964_v45 = vld [vmem:[%s2351_s3 + $0xa0] sm:$0xff]   ;;  %v1966_v47 = vld [vmem:[%s2351_s3 + $0x90] sm:$0xff]   ;;  %v1967_v48 = vld [vmem:[%s2351_s3 + $0x88] sm:$0xff]  }
  0x20   : > { %1784 = vmatprep.mubr.msk.bf16.mxu1 %vm459_vm3, %v1958_v6  ;;  %v307_v16 = vadd.f32 %v1690_v10, %v1566_v9  ;;  %v308_v17 = vadd.f32 %v1691_v11, %v1566_v9  ;;  %v311_v34 = vadd.f32 %v1698_v29, %v1566_v9  ;;  %v312_v35 = vadd.f32 %v1699_v30, %v1566_v9  ;;  %v1968_v49 = vld [vmem:[%s2351_s3 + $0x80] sm:$0xff]   ;;  %v1969_v50 = vld [vmem:[%s2351_s3 + $0x108] sm:$0xff]  }
  0x21   : > { %v317_v23 = vmax.f32 %v309_v19, 0.0  ;;  %v318_v24 = vmax.f32 %v310_v20, 0.0  ;;  %v313_v36 = vadd.f32 %v1702_v31, %v1566_v9  ;;  %v314_v37 = vadd.f32 %v1703_v33, %v1566_v9  ;;  %1812 = vmatprep.subr.bf16.mxu1 %v1969_v50  ;;  %v1575_v53 = vld [vmem:[%s2352_s4 + $0x2] ss:$0 sm:$0xff]  ;;  %v1601_v33 = vld [vmem:[%s2352_s4 + $0x3] ss:$0 sm:$0xff] }
  0x22   : > { %v315_v21 = vmax.f32 %v307_v16, 0.0  ;;  %v316_v22 = vmax.f32 %v308_v17, 0.0  ;;  %v319_v38 = vmax.f32 %v311_v34, 0.0  ;;  %v320_v39 = vmax.f32 %v312_v35, 0.0  ;;  %1813 = vmatpush3.bf16.msra.mxu1 %v1969_v50  ;;  %v1970_v16 = vld [vmem:[%s2351_s3 + $0x100] sm:$0xff]   ;;  %v1971_v17 = vld [vmem:[%s2351_s3 + $0x148] sm:$0xff]  }
  0x23   : > { %v324_v32 = vpack.c.bf16 %v318_v24, %v317_v23  ;;  %v321_v40 = vmax.f32 %v313_v36, 0.0  ;;  %v322_v42 = vmax.f32 %v314_v37, 0.0  ;;  %1814 = vmatprep.subr.bf16.mxu1 %v1970_v16  ;;  %v2038_v19 = vmov 0.0   ;;  %v1974_v20 = vld [vmem:[%s2351_s3 + $0xc0] sm:$0xff]  }
  0x24   : > { %v323_v28 = vpack.c.bf16 %v316_v22, %v315_v21  ;;  %v325_v43 = vpack.c.bf16 %v320_v39, %v319_v38  ;;  %v903_v21 = vld [vmem:[%s2110_s6] sm:$0xf] }
  0x25   : > { %v326_v44 = vpack.c.bf16 %v322_v42, %v321_v40 }
  0x26   : > { %1770 = vmatprep.mubr.msk.bf16.mxu0 %vm340_vm4, %v323_v28  ;;  %1815 = vmatpush3.bf16.msra.mxu1 %v1970_v16 }
  0x27   : > { %1785 = vmatmul.mubr.msk.bf16.gmra.mxu1 %vm459_vm3, %v1959_v18  ;;  %1771 = vmatmul.mubr.msk.bf16.vlgmr.msra.gmra.mxu0 %vm340_vm4, %v324_v32  ;;  %v1973_v18 = vld [vmem:[%s2351_s3 + $0xc8] sm:$0xff]   ;;  %v1567_v32 = vld [vmem:[%s2352_s4 + $0x1] ss:$0 sm:$0xff] }
  0x28   : > { %1789 = vmatpush3.bf16.msra.mxu0 %v1961_v15  ;;  %1774 = vmatprep.mubr.msk.bf16.mxu0 %vm340_vm4, %v325_v43 }
  0x29   : > { %1790 = vmatprep.subr.bf16.mxu0 %v1962_v25  ;;  %1824 = vmatprep.subr.bf16.mxu1 %v1971_v17 }
  0x2c   : > { %1791 = vmatpush3.bf16.msra.mxu0 %v1962_v25 }
  0x2d   : > { %1792 = vmatprep.subr.bf16.mxu0 %v1963_v41 }
  0x2f   : > { %1775 = vmatmul.mubr.msk.bf16.gmra.mxu0 %vm340_vm4, %v326_v44 }
  0x30   : > { %1793 = vmatpush3.bf16.msra.mxu0 %v1963_v41 }
  0x31   : > { %1794 = vmatprep.subr.bf16.mxu0 %v1964_v45 }
  0x34   : > { %1795 = vmatpush3.bf16.msra.mxu0 %v1964_v45 }
  0x35   : > { %1796 = vmatprep.subr.bf16.mxu0 %v1965_v46 }
  0x38   : > { %1797 = vmatpush3.bf16.msra.mxu0 %v1965_v46 }
  0x39   : > { %1798 = vmatprep.subr.bf16.mxu0 %v1966_v47 }
  0x3c   : > { %1799 = vmatpush3.bf16.msra.mxu0 %v1966_v47 }
  0x3d   : > { %1800 = vmatprep.subr.bf16.mxu0 %v1967_v48 }
  0x40   : > { %1801 = vmatpush3.bf16.msra.mxu0 %v1967_v48 }
  0x41   : > { %1802 = vmatprep.subr.bf16.mxu0 %v1968_v49 }
  0x44   : > { %1803 = vmatpush3.bf16.msra.mxu0 %v1968_v49 }
  0x45   : > { %1836 = vmatprep.subr.bf16.mxu0 %v2038_v19 }
  0xdf   : > { %v1782_v51 = vpop.f32.mrf.mxu1 }
  0xe0   : > { %v519_v57 = vadd.f32 %v1782_v51, %v1575_v53 }
  0xe1   : > { %v510_v52 = vpop.f32.mrf.mxu1 }
  0xe2   : > { %v511_v55 = vadd.f32 %v1575_v53, %v510_v52  ;;  %v543_v0 = vmax.f32 %v519_v57, 0.0 }
  0xe3   : > { %v1783_v54 = vpop.f32.mrf.mxu1 }
  0xe4   : > { %v522_v56 = vadd.f32 %v1783_v54, %v1575_v53  ;;  %v541_v62 = vmax.f32 %v511_v55, 0.0 }
  0xe5   : > { %v513_v58 = vpop.f32.mrf.mxu1 }
  0xe6   : > { %v514_v59 = vadd.f32 %v1575_v53, %v513_v58  ;;  %v544_v60 = vmax.f32 %v522_v56, 0.0 }
  0xe7   : > { %v1786_v61 = vpop.f32.mrf.mxu1  ;;  %v1772_v22 = vpop.f32.mrf.mxu0 }
  0xe8   : > { %v542_v63 = vmax.f32 %v514_v59, 0.0  ;;  %v550_v3 = vpack.c.bf16 %v544_v60, %v543_v0  ;;  %v535_v7 = vadd.f32 %v1786_v61, %v1575_v53  ;;  %v396_v43 = vadd.f32 %v1772_v22, %v1567_v32 }
  0xe9   : > { %v526_v1 = vpop.f32.mrf.mxu1  ;;  %v387_v23 = vpop.f32.mrf.mxu0 }
  0xea   : > { %v549_v2 = vpack.c.bf16 %v542_v63, %v541_v62  ;;  %v527_v5 = vadd.f32 %v1575_v53, %v526_v1  ;;  %v547_v13 = vmax.f32 %v535_v7, 0.0  ;;  %v388_v40 = vadd.f32 %v1567_v32, %v387_v23 }
  0xeb   : > { %v1787_v4 = vpop.f32.mrf.mxu1  ;;  %v1773_v24 = vpop.f32.mrf.mxu0 }
  0xec   : > { %v538_v6 = vadd.f32 %v1787_v4, %v1575_v53  ;;  %1804 = vmatprep.mubr.bf16.mxu0 %v549_v2  ;;  %v545_v11 = vmax.f32 %v527_v5, 0.0  ;;  %v399_v37 = vadd.f32 %v1773_v24, %v1567_v32 }
  0xed   : > { %v529_v8 = vpop.f32.mrf.mxu1  ;;  %1805 = vmatmul.mubr.bf16.vlgmr.msra.gmra.mxu0 %v550_v3  ;;  %v390_v25 = vpop.f32.mrf.mxu0 }
  0xee   : > { %v530_v9 = vadd.f32 %v1575_v53, %v529_v8  ;;  %v548_v10 = vmax.f32 %v538_v6, 0.0  ;;  %1837 = vmatpush3.bf16.msra.mxu0 %v1973_v18  ;;  %v391_v41 = vadd.f32 %v1567_v32, %v390_v25  ;;  %v1972_v53 = vld [vmem:[%s2351_s3 + $0x140] sm:$0xff]   ;;  %v801_v6 = vpack.c.bf16 %v399_v37, %v396_v43 }
  0xef   : > { %1838 = vmatprep.subr.bf16.mxu0 %v2038_v19  ;;  %v1776_v26 = vpop.f32.mrf.mxu0 }
  0xf0   : > { %v546_v12 = vmax.f32 %v530_v9, 0.0  ;;  %v552_v15 = vpack.c.bf16 %v548_v10, %v547_v13  ;;  %v412_v62 = vadd.f32 %v1776_v26, %v1567_v32  ;;  %v800_v5 = vpack.c.bf16 %v391_v41, %v388_v40 }
  0xf1   : > { %v403_v27 = vpop.f32.mrf.mxu0 }
  0xf2   : > { %v551_v14 = vpack.c.bf16 %v546_v12, %v545_v11  ;;  %1839 = vmatpush3.bf16.msra.mxu0 %v1974_v20  ;;  %v404_v59 = vadd.f32 %v1567_v32, %v403_v27  ;;  %v1614_v20 = vld [vmem:[%s2352_s4 + $0x5] ss:$0 sm:$0xff] }
  0xf3   : > { %1856 = vmatprep.subr.bf16.mxu0 %v2038_v19  ;;  %v1777_v28 = vpop.f32.mrf.mxu0 }
  0xf4   : > { %1808 = vmatprep.mubr.bf16.mxu0 %v551_v14  ;;  %v415_v56 = vadd.f32 %v1777_v28, %v1567_v32 }
  0xf5   : > { %1809 = vmatmul.mubr.bf16.gmra.mxu0 %v552_v15  ;;  %v406_v29 = vpop.f32.mrf.mxu0 }
  0xf6   : > { %1840 = vmatprep.mubr.msk.bf16.mxu0 %vm2039_vm5, %v2038_v19  ;;  %v407_v60 = vadd.f32 %v1567_v32, %v406_v29  ;;  %v803_v8 = vpack.c.bf16 %v415_v56, %v412_v62 }
  0xf8   : > { %v802_v7 = vpack.c.bf16 %v407_v60, %v404_v59 }
  0xfd   : > { %1841 = vmatmul.mubr.msk.bf16.vlgmr.msra.gmra.mxu0 %vm722_vm6, %v903_v21 }
  0xfe   : > { %1864 = vmatprep.mubr.msk.bf16.mxu0 %vm2039_vm5, %v2038_v19 }
 0x1ad   : > { %v1806_v30 = vpop.f32.mrf.mxu0 }
 0x1ae   : > { %v666_v38 = vadd.f32 %v1806_v30, %v1601_v33 }
 0x1af   : > { %v657_v31 = vpop.f32.mrf.mxu0 }
 0x1b0   : > { %v658_v35 = vadd.f32 %v1601_v33, %v657_v31  ;;  %v690_v48 = vadd.f32 %v666_v38, %v396_v43 }
 0x1b1   : > { %v1807_v34 = vpop.f32.mrf.mxu0 }
 0x1b2   : > { %v669_v36 = vadd.f32 %v1807_v34, %v1601_v33  ;;  %v688_v46 = vadd.f32 %v658_v35, %v388_v40 }
 0x1b3   : > { %v660_v39 = vpop.f32.mrf.mxu0 }
 0x1b4   : > { %v661_v42 = vadd.f32 %v1601_v33, %v660_v39  ;;  %v691_v44 = vadd.f32 %v669_v36, %v399_v37  ;;  %v1625_v39 = vld [vmem:[%s2352_s4 + $0x6] ss:$0 sm:$0xff] }
 0x1b5   : > { %v1810_v45 = vpop.f32.mrf.mxu0 }
 0x1b6   : > { %v689_v47 = vadd.f32 %v661_v42, %v391_v41  ;;  %v697_v51 = vpack.c.bf16 %v691_v44, %v690_v48  ;;  %v682_v57 = vadd.f32 %v1810_v45, %v1601_v33 }
 0x1b7   : > { %v673_v49 = vpop.f32.mrf.mxu0 }
 0x1b8   : > { %v696_v50 = vpack.c.bf16 %v689_v47, %v688_v46  ;;  %v674_v54 = vadd.f32 %v1601_v33, %v673_v49  ;;  %v694_v2 = vadd.f32 %v682_v57, %v412_v62 }
 0x1b9   : > { %v1811_v52 = vpop.f32.mrf.mxu0 }
 0x1ba   : > { %v685_v55 = vadd.f32 %v1811_v52, %v1601_v33  ;;  %1816 = vmatprep.mubr.msk.bf16.mxu1 %vm722_vm6, %v696_v50  ;;  %v692_v0 = vadd.f32 %v674_v54, %v404_v59 }
 0x1bb   : > { %v676_v58 = vpop.f32.mrf.mxu0  ;;  %1817 = vmatmul.mubr.msk.bf16.vlgmr.msra.gmra.mxu1 %vm722_vm6, %v697_v51 }
 0x1bc   : > { %v677_v61 = vadd.f32 %v1601_v33, %v676_v58  ;;  %1825 = vmatpush3.bf16.msra.mxu1 %v1971_v17  ;;  %v695_v63 = vadd.f32 %v685_v55, %v415_v56  ;;  %v1636_v55 = vld [vmem:[%s2352_s4 + $0x4] ss:$0 sm:$0xff] }
 0x1bd   : > { %1826 = vmatprep.subr.bf16.mxu1 %v1972_v53  ;;  %v963_v9 = vpop.f32.mrf.mxu0 }
 0x1be   : > { %v693_v1 = vadd.f32 %v677_v61, %v407_v60  ;;  %v699_v4 = vpack.c.bf16 %v695_v63, %v694_v2  ;;  %v964_v59 = vadd.f32 %v1636_v55, %v963_v9  ;;  %v1030_v63 = vlaneseq  ;;  %v1036_v9 = vld [vmem:[#allocation2] sm:$0xff] }
 0x1bf   : > { %v1842_v10 = vpop.f32.mrf.mxu0 }
 0x1c0   : > { %v698_v3 = vpack.c.bf16 %v693_v1, %v692_v0  ;;  %1827 = vmatpush3.bf16.msra.mxu1 %v1972_v53  ;;  %v969_v62 = vpack.c.bf16 %v964_v59, %v964_v59  ;;  %v1031_v0 = vand.u32 127, %v1030_v63  ;;  %v1032_v1 = vstv %s1641_s9 }
 0x1c1   : > { %1844 = vmatprep.subr.bf16.mxu1 %v2038_v19  ;;  %v966_v11 = vpop.f32.mrf.mxu0 }
 0x1c2   : > { %1820 = vmatprep.mubr.msk.bf16.mxu1 %vm722_vm6, %v698_v3  ;;  %v1033_v2 = vadd.s32 %v1032_v1, %v1031_v0 }
 0x1c3   : > { %1821 = vmatmul.mubr.msk.bf16.gmra.mxu1 %vm722_vm6, %v699_v4  ;;  %v1843_v12 = vpop.f32.mrf.mxu0 }
 0x1c4   : > { %1828 = vmatprep.mubr.msk.bf16.mxu1 %vm722_vm6, %v800_v5  ;;  %vm1034_vm7 = vcmp.lt.s32.totalorder %v1033_v2, 128 }
 0x1cb   : > { %1829 = vmatmul.mubr.msk.bf16.vlgmr.msra.gmra.mxu1 %vm722_vm6, %v801_v6 }
 0x1cc   : > { %1832 = vmatprep.mubr.msk.bf16.mxu1 %vm722_vm6, %v802_v7 }
 0x1d3   : > { %1833 = vmatmul.mubr.msk.bf16.gmra.mxu1 %vm722_vm6, %v803_v8  ;;  %v2040_v8 = vmov 0  }
 0x1d4   : > { %1852 = vmatprep.mubr.msk.bf16.mxu1 %vm2039_vm5, %v2038_v19  ;;  %1953 = vset.pattern.permute.xlu0 %v2040_v8 }
 0x1d5   : > { %1954 = vset.pattern.permute.xlu1 %v2040_v8 }
 0x27b   : > { %v1818_v13 = vpop.f32.mrf.mxu1 }
 0x27c   : > { %v778_v38 = vadd.f32 %v1818_v13, %v1614_v20 }
 0x27d   : > { %v769_v14 = vpop.f32.mrf.mxu1 }
 0x27e   : > { %v770_v50 = vadd.f32 %v1614_v20, %v769_v14 }
 0x27f   : > { %v1819_v15 = vpop.f32.mrf.mxu1 }
 0x280   : > { %v781_v35 = vadd.f32 %v1819_v15, %v1614_v20 }
 0x281   : > { %v772_v16 = vpop.f32.mrf.mxu1 }
 0x282   : > { %v971_v41 = vpack.c.bf16 %v781_v35, %v778_v38  ;;  %v773_v47 = vadd.f32 %v1614_v20, %v772_v16 }
 0x283   : > { %v1822_v17 = vpop.f32.mrf.mxu1 }
 0x284   : > { %v794_v22 = vadd.f32 %v1822_v17, %v1614_v20  ;;  %v981_v49 = vsel %vm722_vm6, %v971_v41, 0  ;;  %v970_v53 = vpack.c.bf16 %v773_v47, %v770_v50 }
 0x285   : > { %v785_v18 = vpop.f32.mrf.mxu1 }
 0x286   : > { %v786_v30 = vadd.f32 %v1614_v20, %v785_v18  ;;  %v978_v60 = vsel %vm722_vm6, %v970_v53, 0 }
 0x287   : > { %v1823_v21 = vpop.f32.mrf.mxu1 }
 0x288   : > { %v797_v23 = vadd.f32 %v1823_v21, %v1614_v20 }
 0x289   : > { %v788_v24 = vpop.f32.mrf.mxu1 }
 0x28a   : > { %v973_v25 = vpack.c.bf16 %v797_v23, %v794_v22  ;;  %v789_v27 = vadd.f32 %v1614_v20, %v788_v24  ;;  %v1053_v22 = vld [vmem:[#allocation3] sm:$0xff] }
 0x28b   : > { %v1830_v26 = vpop.f32.mrf.mxu1 }
 0x28c   : > { %v987_v28 = vsel %vm722_vm6, %v973_v25, 0  ;;  %v972_v32 = vpack.c.bf16 %v789_v27, %v786_v30  ;;  %v881_v54 = vadd.f32 %v1830_v26, %v1625_v39  ;;  %v1061_v26 = vld [vmem:[#allocation4] sm:$0xff] }
 0x28d   : > { %v872_v29 = vpop.f32.mrf.mxu1  ;;  %1845 = vmatpush3.bf16.xpose.msra.mxu1 %v987_v28 }
 0x28e   : > { %1846 = vmatprep.subr.bf16.mxu1 %v2038_v19  ;;  %v984_v36 = vsel %vm722_vm6, %v972_v32, 0  ;;  %v873_v58 = vadd.f32 %v1625_v39, %v872_v29 }
 0x28f   : > { %v1831_v31 = vpop.f32.mrf.mxu1 }
 0x290   : > { %v884_v51 = vadd.f32 %v1831_v31, %v1625_v39 }
 0x291   : > { %v875_v33 = vpop.f32.mrf.mxu1 }
 0x292   : > { %v1070_v56 = vpack.c.bf16 %v884_v51, %v881_v54  ;;  %v876_v57 = vadd.f32 %v1625_v39, %v875_v33 }
 0x293   : > { %v1834_v34 = vpop.f32.mrf.mxu1 }
 0x294   : > { %v897_v42 = vadd.f32 %v1834_v34, %v1625_v39  ;;  %v1069_v61 = vpack.c.bf16 %v876_v57, %v873_v58 }
 0x295   : > { %v888_v37 = vpop.f32.mrf.mxu1  ;;  %1847 = vmatpush3.bf16.xpose.msra.mxu1 %v984_v36 }
 0x296   : > { %1848 = vmatprep.subr.bf16.mxu1 %v2038_v19  ;;  %v889_v48 = vadd.f32 %v1625_v39, %v888_v37 }
 0x297   : > { %v1835_v40 = vpop.f32.mrf.mxu1 }
 0x298   : > { %v900_v43 = vadd.f32 %v1835_v40, %v1625_v39 }
 0x299   : > { %v891_v44 = vpop.f32.mrf.mxu1 }
 0x29a   : > { %v1072_v45 = vpack.c.bf16 %v900_v43, %v897_v42  ;;  %v892_v46 = vadd.f32 %v1625_v39, %v891_v44 }
 0x29c   : > { %1857 = vmatpush3.bf16.msra.mxu0 %v1072_v45  ;;  %v1071_v52 = vpack.c.bf16 %v892_v46, %v889_v48 }
 0x29d   : > { %1849 = vmatpush3.bf16.xpose.msra.mxu1 %v981_v49  ;;  %1858 = vmatprep.subr.bf16.mxu0 %v2038_v19 }
 0x29e   : > { %1850 = vmatprep.subr.bf16.mxu1 %v2038_v19 }
 0x2a0   : > { %1859 = vmatpush3.bf16.msra.mxu0 %v1071_v52 }
 0x2a1   : > { %1860 = vmatprep.subr.bf16.mxu0 %v2038_v19 }
 0x2a4   : > { %1861 = vmatpush3.bf16.msra.mxu0 %v1070_v56 }
 0x2a5   : > { %1851 = vmatpush3.bf16.xpose.msra.mxu1 %v978_v60  ;;  %1862 = vmatprep.subr.bf16.mxu0 %v2038_v19 }
 0x2a8   : > { %1863 = vmatpush3.bf16.msra.mxu0 %v1069_v61 }
 0x2ac   : > { %1853 = vmatmul.mubr.msk.bf16.vlgmr.msra.gmra.mxu1 %vm722_vm6, %v969_v62 }
 0x36c   : > { %v1023_v3 = vpop.f32.mrf.mxu1 }
 0x36d   : > { %v1035_v4 = vsel %vm1034_vm7, %v1023_v3, -1e+30 }
 0x36e   : > { %v1854_v5 = vpop.f32.mrf.mxu1  ;;  %v1038_v6 = vsel %vm1037_vm8, %v1035_v4, -inf }
 0x36f   : > { %1039 = vmax.xlane.f32.xlu0 %v1038_v6 }
 0x370   : > { %v1026_v7 = vpop.f32.mrf.mxu1 }
 0x372   : > { %v1855_v19 = vpop.f32.mrf.mxu1 }
 0x3f8   : > { %v1040_v10 = vpop.xlane.xlu0 %1039 }
 0x3f9   : > { %v1041_v11 = vmax.f32 %v1036_v9, %v1040_v10 }
 0x3fb   : > { %v1042_v12 = vsub.f32 %v1036_v9, %v1041_v11  ;;  %1118 = vst.msk [vmem:[#allocation2] sm:$0xff] %vm1059_vm9, %v1041_v11  ;;  %1047 = vperm.xlu0 %1953, %v1041_v11  }
 0x3fd   : > { %v1043_v17 = vmul.f32 1.442695, %v1042_v12 }
 0x476   : > { %v1048_v13 = vpop.permute.xlu0 %1047 }
 0x477   : > { %v1050_v14 = vsub.f32 %v1035_v4, %v1048_v13 }
 0x479   : > { %v1051_v15 = vmul.f32 1.442695, %v1050_v14 }
 0x47b   : > { %1975 = vpow2.f32 %v1051_v15 }
 0x47c   : > { %1977 = vpow2.f32 %v1043_v17 }
 0x488   : > { %v1976_v16 = vpop.eup %1975 }
 0x489   : > { %v1055_v18 = vsel %vm1037_vm8, %v1976_v16, 0.0  ;;  %v1068_v20 = vpack.c.bf16 %v1976_v16, %v1976_v16  ;;  %v1978_v21 = vpop.eup %1977 }
 0x48a   : > { %1056 = vadd.xlane.f32.xlu1 %v1055_v18  ;;  %v1054_v23 = vmul.f32 %v1978_v21, %v1053_v22 }
 0x48b   : > { %1865 = vmatmul.mubr.msk.bf16.vlgmr.msra.gmra.mxu0 %vm1037_vm8, %v1068_v20 }
 0x49b   : > { %1064 = vperm.xlu1 %1954, %v1978_v21  }
 0x513   : > { %v1057_v24 = vpop.xlane.xlu1 %1056 }
 0x514   : > { %v1058_v25 = vadd.f32 %v1057_v24, %v1054_v23 }
 0x516   : > { %1060 = vst.msk [vmem:[#allocation3] sm:$0xff] %vm1059_vm9, %v1058_v25 }
 0x517   : > { %v1065_v27 = vpop.permute.xlu1 %1064 }
 0x518   : > { %v1067_v28 = vmul.f32 %v1065_v27, %v1061_v26 }
 0x54b   : > { %v1110_v29 = vpop.f32.mrf.mxu0 }
 0x54c   : > { %v1116_v30 = vadd.f32 %v1110_v29, %v1067_v28 }
 0x54d   : > { %v1866_v31 = vpop.f32.mrf.mxu0  ;;  %1122 = sbr.rel (%p1643_p8) target bundleno = 2915 (0xb63), region = 48 }
 0x54e   : > { %1117 = vst.msk [vmem:[#allocation4] sm:$0xff] %vm722_vm6, %v1116_v30 }
 0x54f   : > { %v1113_v32 = vpop.f32.mrf.mxu0 }
 0x551   : > { %v1867_v33 = vpop.f32.mrf.mxu0 }
 0x552   : > { %v1124_v34 = vld [vmem:[#allocation3] sm:$0xff]  ;;  %v2041_v36 = vmov 0   ;;  %v2042_v37 = vmov 0.0   ;;  %v1981_v38 = vld [vmem:[%s2351_s3 + $0x180] sm:$0xff]   ;;  %vm2043_vm10 = vmmov 0   ;;  %v1984_v58 = vld [vmem:[%s2351_s3 + $0x218] sm:$0xff]  }
 0x553   : > { %v1980_v35 = vld [vmem:[%s2351_s3 + $0x188] sm:$0xff]   ;;  %1979 = vset.pattern.permute.xlu0 %v2041_v36  ;;  %1990 = vrcp.f32 %v1124_v34  ;;  %1868 = vmatprep.subr.bf16.mxu0 %v2042_v37  ;;  %v1648_v44 = vld [vmem:[%s2352_s4 + $0x7] ss:$0 sm:$0xff]  ;;  %v1985_v59 = vld [vmem:[%s2351_s3 + $0x210] sm:$0xff]  }
 0x554   : > { %1869 = vmatpush3.bf16.msra.mxu0 %v1980_v35  ;;  %1876 = vmatprep.subr.bf16.mxu1 %v2042_v37  ;;  %v1982_v56 = vld [vmem:[%s2351_s3 + $0x1c8] sm:$0xff]   ;;  %v1983_v57 = vld [vmem:[%s2351_s3 + $0x1c0] sm:$0xff]  }
 0x555   : > { %1870 = vmatprep.subr.bf16.mxu0 %v2042_v37  ;;  %1872 = vmatprep.mubr.msk.bf16.mxu0 %vm2043_vm10, %v2042_v37  ;;  %v1123_v40 = vld [vmem:[#allocation4] sm:$0xff]  ;;  %v1652_v0 = vld [vmem:[%s2352_s4 + $0x8] ss:$0 sm:$0xff]  ;;  %v1653_v2 = vld [vmem:[%s2352_s4 + $0x9] ss:$0 sm:$0xff] }
 0x556   : > { %1880 = vmatprep.mubr.msk.bf16.mxu1 %vm2043_vm10, %v2042_v37  ;;  %1877 = vmatpush3.bf16.msra.mxu1 %v1982_v56  ;;  %v1986_v6 = vld [vmem:[%s2351_s3 + $0x208] sm:$0xff]   ;;  %v1987_v7 = vld [vmem:[%s2351_s3 + $0x200] sm:$0xff]  }
 0x557   : > { %1878 = vmatprep.subr.bf16.mxu1 %v2042_v37  ;;  %v1658_v19 = vld [vmem:[%s2352_s4 + $0xa] ss:$0 sm:$0xff]  ;;  %v1670_v15 = vld [vmem:[%s2352_s4 + $0xb] ss:$0 sm:$0xff]  ;;  %v1989_v30 = vld [vmem:[%s2351_s3 + $0x240] sm:$0xff]  }
 0x558   : > { %1871 = vmatpush3.bf16.msra.mxu0 %v1981_v38  ;;  %v1988_v29 = vld [vmem:[%s2351_s3 + $0x248] sm:$0xff]  }
 0x559   : > { %1884 = vmatprep.subr.bf16.mxu0 %v2042_v37  ;;  %v1676_v35 = vld [vmem:[%s2352_s4 + $0xc] ss:$0 sm:$0xff]  ;;  %v1677_v38 = vld [vmem:[%s2352_s4 + $0xd] ss:$0 sm:$0xff] }
 0x55a   : > { %1879 = vmatpush3.bf16.msra.mxu1 %v1983_v57 }
 0x55b   : > { %1896 = vmatprep.subr.bf16.mxu1 %v2042_v37 }
 0x560   : > { %v1991_v39 = vpop.eup %1990 }
 0x561   : > { %1128 = vperm.xlu0 %1979, %v1991_v39  }
 0x5dc   : > { %v1129_v41 = vpop.permute.xlu0 %1128 }
 0x5dd   : > { %v1131_v42 = vmul.f32 %v1129_v41, %v1123_v40 }
 0x5df   : > { %v1132_v43 = vpack.c.bf16 %v1131_v42, %v1131_v42 }
 0x5e1   : > { %1873 = vmatmul.mubr.msk.bf16.vlgmr.msra.gmra.mxu0 %vm722_vm6, %v1132_v43 }
 0x5e2   : > { %1892 = vmatprep.mubr.msk.bf16.mxu0 %vm2043_vm10, %v2042_v37  ;;  %1885 = vmatpush3.bf16.msra.mxu0 %v1984_v58 }
 0x5e3   : > { %1886 = vmatprep.subr.bf16.mxu0 %v2042_v37 }
 0x5e6   : > { %1887 = vmatpush3.bf16.msra.mxu0 %v1985_v59 }
 0x5e7   : > { %1888 = vmatprep.subr.bf16.mxu0 %v2042_v37 }
 0x5ea   : > { %1889 = vmatpush3.bf16.msra.mxu0 %v1986_v6 }
 0x5eb   : > { %1890 = vmatprep.subr.bf16.mxu0 %v2042_v37 }
 0x5ee   : > { %1891 = vmatpush3.bf16.msra.mxu0 %v1987_v7 }
 0x6a1   : > { %v1192_v45 = vpop.f32.mrf.mxu0 }
 0x6a2   : > { %v1193_v46 = vadd.f32 %v1648_v44, %v1192_v45 }
 0x6a3   : > { %v1874_v47 = vpop.f32.mrf.mxu0 }
 0x6a4   : > { %v1198_v48 = vsel %vm722_vm6, %v1193_v46, 0.0 }
 0x6a5   : > { %1199 = vadd.xlane.f32.xlu0 %v1198_v48  ;;  %v1195_v49 = vpop.f32.mrf.mxu0 }
 0x6a7   : > { %v1875_v50 = vpop.f32.mrf.mxu0 }
 0x72e   : > { %v1200_v51 = vpop.xlane.xlu0 %1199 }
 0x72f   : > { %v1202_v52 = vmul.f32 0.03125, %v1200_v51 }
 0x731   : > { %v1203_v53 = vsub.f32 %v1193_v46, %v1202_v52 }
 0x733   : > { %v1204_v54 = vmul.f32 %v1203_v53, %v1203_v53 }
 0x735   : > { %v1205_v55 = vsel %vm722_vm6, %v1204_v54, 0.0 }
 0x736   : > { %1206 = vadd.xlane.f32.xlu1 %v1205_v55 }
 0x7bf   : > { %v1207_v60 = vpop.xlane.xlu1 %1206 }
 0x7c0   : > { %v1208_v61 = vmul.f32 0.03125, %v1207_v60 }
 0x7c2   : > { %v1209_v62 = vadd.f32 1e-05, %v1208_v61 }
 0x7c4   : > { %1992 = vrsqrt.f32 %v1209_v62 }
 0x7d1   : > { %v1993_v63 = vpop.eup %1992 }
 0x7d2   : > { %v1211_v1 = vmul.f32 %v1993_v63, %v1203_v53 }
 0x7d4   : > { %v1217_v3 = vmul.f32 %v1652_v0, %v1211_v1 }
 0x7d6   : > { %v1223_v4 = vadd.f32 %v1653_v2, %v1217_v3 }
 0x7d8   : > { %v1224_v5 = vpack.c.bf16 %v1223_v4, %v1223_v4 }
 0x7da   : > { %1881 = vmatmul.mubr.msk.bf16.vlgmr.msra.gmra.mxu1 %vm722_vm6, %v1224_v5 }
 0x7db   : > { %1900 = vmatprep.mubr.msk.bf16.mxu1 %vm2043_vm10, %v2042_v37  ;;  %1897 = vmatpush3.bf16.msra.mxu1 %v1988_v29 }
 0x7dc   : > { %1898 = vmatprep.subr.bf16.mxu1 %v2042_v37  ;;  %v1682_v37 = vld [vmem:[%s2352_s4 + $0xe] ss:$0 sm:$0xff] }
 0x7df   : > { %1899 = vmatpush3.bf16.msra.mxu1 %v1989_v30 }
 0x89a   : > { %v1284_v8 = vpop.f32.mrf.mxu1 }
 0x89b   : > { %v1285_v9 = vadd.f32 %v1658_v19, %v1284_v8 }
 0x89c   : > { %v1882_v10 = vpop.f32.mrf.mxu1 }
 0x89d   : > { %v1290_v11 = vmax.f32 %v1285_v9, 0.0 }
 0x89e   : > { %v1287_v12 = vpop.f32.mrf.mxu1 }
 0x89f   : > { %v1291_v13 = vpack.c.bf16 %v1290_v11, %v1290_v11 }
 0x8a0   : > { %v1883_v14 = vpop.f32.mrf.mxu1 }
 0x8a1   : > { %1893 = vmatmul.mubr.msk.bf16.vlgmr.msra.gmra.mxu0 %vm1037_vm8, %v1291_v13 }
 0x961   : > { %v1367_v16 = vpop.f32.mrf.mxu0 }
 0x962   : > { %v1368_v17 = vadd.f32 %v1670_v15, %v1367_v16 }
 0x963   : > { %v1894_v18 = vpop.f32.mrf.mxu0 }
 0x964   : > { %v1373_v20 = vadd.f32 %v1368_v17, %v1223_v4 }
 0x965   : > { %v1370_v21 = vpop.f32.mrf.mxu0 }
 0x966   : > { %v1374_v22 = vsel %vm722_vm6, %v1373_v20, 0.0 }
 0x967   : > { %1375 = vadd.xlane.f32.xlu1 %v1374_v22  ;;  %v1895_v23 = vpop.f32.mrf.mxu0 }
 0x9f0   : > { %v1376_v24 = vpop.xlane.xlu1 %1375 }
 0x9f1   : > { %v1377_v25 = vmul.f32 0.03125, %v1376_v24 }
 0x9f3   : > { %v1378_v26 = vsub.f32 %v1373_v20, %v1377_v25 }
 0x9f5   : > { %v1379_v27 = vmul.f32 %v1378_v26, %v1378_v26 }
 0x9f7   : > { %v1380_v28 = vsel %vm722_vm6, %v1379_v27, 0.0 }
 0x9f8   : > { %1381 = vadd.xlane.f32.xlu1 %v1380_v28 }
 0xa81   : > { %v1382_v31 = vpop.xlane.xlu1 %1381 }
 0xa82   : > { %v1383_v32 = vmul.f32 0.03125, %v1382_v31 }
 0xa84   : > { %v1384_v33 = vadd.f32 1e-05, %v1383_v32 }
 0xa86   : > { %1994 = vrsqrt.f32 %v1384_v33 }
 0xa93   : > { %v1995_v34 = vpop.eup %1994 }
 0xa94   : > { %v1386_v36 = vmul.f32 %v1995_v34, %v1378_v26 }
 0xa96   : > { %v1392_v39 = vmul.f32 %v1676_v35, %v1386_v36 }
 0xa98   : > { %v1398_v40 = vadd.f32 %v1677_v38, %v1392_v39 }
 0xa9a   : > { %v1399_v41 = vpack.c.bf16 %v1398_v40, %v1398_v40 }
 0xa9c   : > { %1901 = vmatmul.mubr.msk.bf16.vlgmr.msra.gmra.mxu1 %vm722_vm6, %v1399_v41 }
 0xb5c   : > { %v1459_v42 = vpop.f32.mrf.mxu1 }
 0xb5d   : > { %v1460_v43 = vadd.f32 %v1682_v37, %v1459_v42 }
 0xb5e   : > { %v1902_v44 = vpop.f32.mrf.mxu1 }
 0xb5f   : > { %1465 = vst [vmem:[%s2125_s15] sm:$0xff] %v1460_v43 }
 0xb60   : > { %v1462_v45 = vpop.f32.mrf.mxu1 }
 0xb62   : > { %v1903_v46 = vpop.f32.mrf.mxu1 }
 0xb63 PF: > { %s15_s22 = sadd.s32 1, %s2034_s22   ;;  %s2354_s18 = smov %s2026_s20 }
 0xb64   : > { %p12_p9 = scmp.ge.s32.totalorder %s15_s22, 6   ;;  %s2355_s19 = smov %s2030_s21 }
 0xb65   : > { %s2356_s20 = smov %s2359_s23  ;;  %s2357_s21 = smov %s2363_s24 }
 0xb66   :  { %14 = sbr.rel (!%p12_p9) target bundleno = 3 (0x3), region = 93 }

</bundles_post_ra>
